<compile_context>
chip_gen: v6e
topology: v6e:2x2x1
jax: 0.10.0
libtpu: 0.0.40
codegen_flags: <defaults>
</compile_context>

<pallas_src>
import functools

import jax
import jax.numpy as jnp
from jax.experimental import pallas as pl
from jax.experimental.pallas import tpu as pltpu


def _round_up(n, m):
    return ((n + m - 1) // m) * m


def _cdiv(a, b):
    return -(-a // b)


def _poly_sin(x):
    """Odd degree-13 polynomial sin; |err| < ~4e-6 for |x| <= 2.8."""
    x2 = x * x
    p = jnp.float32(1.0 / 6227020800.0)           # 1/13!
    p = p * x2 - jnp.float32(1.0 / 39916800.0)    # 1/11!
    p = p * x2 + jnp.float32(1.0 / 362880.0)      # 1/9!
    p = p * x2 - jnp.float32(1.0 / 5040.0)        # 1/7!
    p = p * x2 + jnp.float32(1.0 / 120.0)         # 1/5!
    p = p * x2 - jnp.float32(1.0 / 6.0)           # 1/3!
    return x + x * x2 * p


def _fourier_kernel(x_ref, y_ref, wx_ref, wy_ref, b_ref, o_ref, *, use_poly_sin):
    # x_ref/y_ref: (tm, P) raw packed coords; wx_ref/wy_ref: (P, Fp) block-
    # diagonal weights with normalization folded in; b_ref: (1, Fp);
    # o_ref: (tm, Fp) lane-dense output tile.
    acc = jnp.dot(x_ref[...], wx_ref[...], preferred_element_type=jnp.float32)
    acc = acc + jnp.dot(y_ref[...], wy_ref[...], preferred_element_type=jnp.float32)
    arg = acc + b_ref[...]
    s = _poly_sin(arg) if use_poly_sin else jnp.sin(arg)
    o_ref[...] = s.astype(o_ref.dtype)


def fourier_embedding(y, x, weight, bias, *, height, width,
                      block_rows=8192, out_dtype=jnp.float32,
                      poly_sin="auto"):
    """y, x: (B, N) float coordinates. weight: (F, 2), bias: (F,).

    Returns (B, N, F) `out_dtype`, matching torch.sin(Linear(2, F)(z)).
    """
    B, N = y.shape
    F = int(bias.shape[0])
    M = B * N
    out_bytes = jnp.dtype(out_dtype).itemsize

    # --- pack factor & lane-dense output width -------------------------------
    P = max(1, 128 // F)            # logical rows packed per kernel output row
    Fp_core = P * F                 # useful columns per packed row
    Fp = _round_up(Fp_core, 128)    # zero-padded -> unmasked lane-dense stores

    # --- fold coordinate normalization into the linear layer -----------------
    # NOTE: width==1 / height==1 divides by zero, same hazard as the reference.
    # arg = x_norm*W0 + y_norm*W1 + b
    #     = x*(2*W0/(W-1)) + y*(2*W1/(H-1)) + (b - W0 - W1)
    w32 = weight.astype(jnp.float32)
    b32 = bias.astype(jnp.float32)
    w0 = w32[:, 0] * (2.0 / (width - 1))
    w1 = w32[:, 1] * (2.0 / (height - 1))
    b_f = b32 - w32[:, 0] - w32[:, 1]
    eye = jnp.eye(P, dtype=jnp.float32)
    wx = jnp.einsum("gh,f->ghf", eye, w0).reshape(P, Fp_core)
    wy = jnp.einsum("gh,f->ghf", eye, w1).reshape(P, Fp_core)
    bb = jnp.tile(b_f, P)
    if Fp != Fp_core:
        wx = jnp.pad(wx, ((0, 0), (0, Fp - Fp_core)))
        wy = jnp.pad(wy, ((0, 0), (0, Fp - Fp_core)))
        bb = jnp.pad(bb, (0, Fp - Fp_core))
    bb = bb.reshape(1, Fp)

    # --- sin implementation selection -----------------------------------------
    # The bounded-range polynomial assumes coordinates in [0, W-1] x [0, H-1]
    # (i.e. normalized coords in [-1, 1]) and per-feature |W0|+|W1|+|b| <= 2.8.
    if poly_sin == "auto":
        try:
            bound = float(jnp.max(jnp.abs(w32[:, 0]) + jnp.abs(w32[:, 1])
                                  + jnp.abs(b32)))
            use_poly = bound <= 2.8
        except Exception:     # traced weights: cannot prove the bound
            use_poly = False
    else:
        use_poly = bool(poly_sin)

    # --- row tiling ------------------------------------------------------------
    mp_raw = _cdiv(M, P)                            # packed rows needed
    tm = max(8, (int(block_rows) // 8) * 8)

    # Per-generation VMEM ceiling (v5e/v6e: 128 MiB, v7x: 64 MiB physical).
    try:
        vmem_cap = int(pltpu.get_tpu_info().vmem_capacity_bytes)
    except Exception:
        vmem_cap = 64 * 1024 * 1024
    vmem_ceiling = int(0.75 * vmem_cap)

    const_bytes = 2 * (2 * P * Fp * 4 + Fp * 4)     # Wx, Wy, bias (double-buffered)
    row_bytes = 2 * (2 * P * 4 + Fp * out_bytes)    # x, y, out tiles (double-buffered)
    headroom = 2 * 1024 * 1024
    tm_vmem = max(8, ((vmem_ceiling - const_bytes - headroom) // row_bytes) // 8 * 8)
    tm = min(tm, tm_vmem)

    # Keep >= 4 grid steps when there is enough work so the "parallel" axis can
    # be split across v7x's two TensorCores.
    min_steps = 4
    if mp_raw >= min_steps * 8:
        tm = min(tm, _round_up(_cdiv(mp_raw, min_steps), 8))
    tm = max(8, min(tm, _round_up(mp_raw, 8)))

    Mp = _round_up(mp_raw, tm)
    M_pad = Mp * P
    grid = (Mp // tm,)

    # --- coordinate slabs (no interleave; row-major reshapes are free) --------
    xf = x.reshape(M).astype(jnp.float32)
    yf = y.reshape(M).astype(jnp.float32)
    if M_pad != M:
        xf = jnp.pad(xf, (0, M_pad - M))
        yf = jnp.pad(yf, (0, M_pad - M))
    xp = xf.reshape(Mp, P)
    yp = yf.reshape(Mp, P)

    vmem_limit = int(min(vmem_ceiling,
                         max(16 * 1024 * 1024,
                             tm * row_bytes + const_bytes + headroom)))

    out_p = pl.pallas_call(
        functools.partial(_fourier_kernel, use_poly_sin=use_poly),
        out_shape=jax.ShapeDtypeStruct((Mp, Fp), out_dtype),
        grid_spec=pltpu.PrefetchScalarGridSpec(
            num_scalar_prefetch=0,
            grid=grid,
            in_specs=[
                pl.BlockSpec((tm, P), lambda i: (i, 0)),    # x coords (packed)
                pl.BlockSpec((tm, P), lambda i: (i, 0)),    # y coords (packed)
                pl.BlockSpec((P, Fp), lambda i: (0, 0)),    # Wx (block-diagonal)
                pl.BlockSpec((P, Fp), lambda i: (0, 0)),    # Wy (block-diagonal)
                pl.BlockSpec((1, Fp), lambda i: (0, 0)),    # folded bias
            ],
            out_specs=pl.BlockSpec((tm, Fp), lambda i: (i, 0)),
        ),
        compiler_params=pltpu.CompilerParams(
            dimension_semantics=("parallel",),
            vmem_limit_bytes=vmem_limit,
        ),
    )(xp, yp, wx, wy, bb)

    # Packed row-major layout == logical row-major layout: slice off padded
    # columns/rows, then a free reshape back to (B, N, F).
    out = out_p[:, :Fp_core].reshape(M_pad, F)
    if M_pad != M:
        out = out[:M]
    return out.reshape(B, N, F)


def fourier_embedding_ref(y, x, weight, bias, *, height, width):
    x_norm = 2.0 * x / (width - 1) - 1.0
    y_norm = 2.0 * y / (height - 1) - 1.0
    z = jnp.concatenate([x_norm[..., None], y_norm[..., None]], axis=2)  # (B,N,2)
    return jnp.sin(jnp.einsum("bnk,fk->bnf", z, weight) + bias)


if __name__ == "__main__":
    features, height, width = 32, 16, 16
    B, N = 2, 8  # B*N = 16 coordinate rows

    key = jax.random.PRNGKey(0)
    k_w, k_b, k_y, k_x = jax.random.split(key, 4)

    # Deterministic nn.Linear(2, features)-style init: U(-1/sqrt(2), 1/sqrt(2))
    bound = 1.0 / jnp.sqrt(2.0)
    weight = jax.random.uniform(k_w, (features, 2), jnp.float32, -bound, bound)
    bias = jax.random.uniform(k_b, (features,), jnp.float32, -bound, bound)

    # Pixel-coordinate style inputs in [0, H-1] / [0, W-1]
    y_coord = jax.random.uniform(k_y, (B, N), jnp.float32, 0.0, height - 1.0)
    x_coord = jax.random.uniform(k_x, (B, N), jnp.float32, 0.0, width - 1.0)

    ref = fourier_embedding_ref(y_coord, x_coord, weight, bias,
                                height=height, width=width)

    out = fourier_embedding(y_coord, x_coord, weight, bias,
                            height=height, width=width)
    out = jax.block_until_ready(out)
    assert out.shape == (B, N, features)
    assert jnp.allclose(out, ref, atol=1e-5, rtol=1e-5), "f32 mismatch vs reference"

    # bf16 output path (halves HBM writeback; compute stays f32).
    out_bf16 = fourier_embedding(y_coord, x_coord, weight, bias,
                                 height=height, width=width,
                                 out_dtype=jnp.bfloat16)
    out_bf16 = jax.block_until_ready(out_bf16)
    assert jnp.allclose(out_bf16.astype(jnp.float32), ref,
                        atol=2e-2, rtol=2e-2), "bf16 mismatch vs reference"

    print("KERNEL_OK")
</pallas_src>

<mosaic_0001>
module attributes {stable_mosaic.version = 11 : i64} {
  func.func @_fourier_kernel(%arg0: i32, %arg1: memref<8x4xf32, #tpu.memory_space<vmem>>, %arg2: memref<8x4xf32, #tpu.memory_space<vmem>>, %arg3: memref<4x128xf32, #tpu.memory_space<vmem>>, %arg4: memref<4x128xf32, #tpu.memory_space<vmem>>, %arg5: memref<1x128xf32, #tpu.memory_space<vmem>>, %arg6: memref<8x128xf32, #tpu.memory_space<vmem>>) attributes {dimension_semantics = [#tpu.dimension_semantics<parallel>], iteration_bounds = array<i64: 1>, scalar_prefetch = 0 : i64, scratch_operands = 0 : i64, tpu.core_type = #tpu.core_type<tc>, window_params = [{transform_indices = @transform_0, window_bounds = array<i64: 8, 4>}, {transform_indices = @transform_1, window_bounds = array<i64: 8, 4>}, {pipeline_mode = #tpu.pipeline_mode<synchronous>, transform_indices = @transform_2, window_bounds = array<i64: 4, 128>}, {pipeline_mode = #tpu.pipeline_mode<synchronous>, transform_indices = @transform_3, window_bounds = array<i64: 4, 128>}, {pipeline_mode = #tpu.pipeline_mode<synchronous>, transform_indices = @transform_4, window_bounds = array<i64: 1, 128>}, {transform_indices = @transform_5, window_bounds = array<i64: 8, 128>}]} {
    %c0 = arith.constant 0 : index
    %c0_0 = arith.constant 0 : index
    %0 = vector.load %arg1[%c0, %c0_0] : memref<8x4xf32, #tpu.memory_space<vmem>>, vector<8x4xf32>
    %c0_1 = arith.constant 0 : index
    %c0_2 = arith.constant 0 : index
    %1 = vector.load %arg3[%c0_1, %c0_2] : memref<4x128xf32, #tpu.memory_space<vmem>>, vector<4x128xf32>
    %cst = arith.constant dense<0.000000e+00> : vector<8x128xf32>
    %2 = tpu.matmul %0, %1, %cst {dimension_numbers = #tpu.dot_dimension_numbers<[1], [0], [0], [1], [0, 0, 1, 1], [], []>} : vector<8x4xf32>, vector<4x128xf32>, vector<8x128xf32> -> vector<8x128xf32>
    %c0_3 = arith.constant 0 : index
    %c0_4 = arith.constant 0 : index
    %3 = vector.load %arg2[%c0_3, %c0_4] : memref<8x4xf32, #tpu.memory_space<vmem>>, vector<8x4xf32>
    %c0_5 = arith.constant 0 : index
    %c0_6 = arith.constant 0 : index
    %4 = vector.load %arg4[%c0_5, %c0_6] : memref<4x128xf32, #tpu.memory_space<vmem>>, vector<4x128xf32>
    %cst_7 = arith.constant dense<0.000000e+00> : vector<8x128xf32>
    %5 = tpu.matmul %3, %4, %cst_7 {dimension_numbers = #tpu.dot_dimension_numbers<[1], [0], [0], [1], [0, 0, 1, 1], [], []>} : vector<8x4xf32>, vector<4x128xf32>, vector<8x128xf32> -> vector<8x128xf32>
    %6 = arith.addf %2, %5 : vector<8x128xf32>
    %c0_8 = arith.constant 0 : index
    %c0_9 = arith.constant 0 : index
    %7 = vector.load %arg5[%c0_8, %c0_9] : memref<1x128xf32, #tpu.memory_space<vmem>>, vector<1x128xf32>
    %8 = vector.broadcast %7 : vector<1x128xf32> to vector<8x128xf32>
    %9 = arith.addf %6, %8 : vector<8x128xf32>
    %10 = arith.mulf %9, %9 : vector<8x128xf32>
    %cst_10 = arith.constant 1.60590444E-10 : f32
    %11 = vector.broadcast %cst_10 : f32 to vector<8x128xf32>
    %12 = arith.mulf %11, %10 : vector<8x128xf32>
    %cst_11 = arith.constant 2.50521079E-8 : f32
    %13 = vector.broadcast %cst_11 : f32 to vector<8x128xf32>
    %14 = arith.subf %12, %13 : vector<8x128xf32>
    %15 = arith.mulf %14, %10 : vector<8x128xf32>
    %cst_12 = arith.constant 2.75573188E-6 : f32
    %16 = vector.broadcast %cst_12 : f32 to vector<8x128xf32>
    %17 = arith.addf %15, %16 : vector<8x128xf32>
    %18 = arith.mulf %17, %10 : vector<8x128xf32>
    %cst_13 = arith.constant 1.98412701E-4 : f32
    %19 = vector.broadcast %cst_13 : f32 to vector<8x128xf32>
    %20 = arith.subf %18, %19 : vector<8x128xf32>
    %21 = arith.mulf %20, %10 : vector<8x128xf32>
    %cst_14 = arith.constant 0.00833333377 : f32
    %22 = vector.broadcast %cst_14 : f32 to vector<8x128xf32>
    %23 = arith.addf %21, %22 : vector<8x128xf32>
    %24 = arith.mulf %23, %10 : vector<8x128xf32>
    %cst_15 = arith.constant 0.166666672 : f32
    %25 = vector.broadcast %cst_15 : f32 to vector<8x128xf32>
    %26 = arith.subf %24, %25 : vector<8x128xf32>
    %27 = arith.mulf %9, %10 : vector<8x128xf32>
    %28 = arith.mulf %27, %26 : vector<8x128xf32>
    %29 = arith.addf %9, %28 : vector<8x128xf32>
    %c0_16 = arith.constant 0 : index
    %c0_17 = arith.constant 0 : index
    %30 = vector.load %arg6[%c0_16, %c0_17] : memref<8x128xf32, #tpu.memory_space<vmem>>, vector<8x128xf32>
    tpu.vector_store %arg6[%c0_16, %c0_17], %29 {strides = array<i32>} : memref<8x128xf32, #tpu.memory_space<vmem>>, vector<8x128xf32>,
    return
  }
  func.func @transform_0(%arg0: i32) -> (i32, i32) {
    %c0_i32 = arith.constant 0 : i32
    %c0_i32_0 = arith.constant 0 : i32
    return %arg0, %c0_i32 : i32, i32
  }
  func.func @transform_1(%arg0: i32) -> (i32, i32) {
    %c0_i32 = arith.constant 0 : i32
    %c0_i32_0 = arith.constant 0 : i32
    return %arg0, %c0_i32 : i32, i32
  }
  func.func @transform_2(%arg0: i32) -> (i32, i32) {
    %c0_i32 = arith.constant 0 : i32
    %c0_i32_0 = arith.constant 0 : i32
    %c0_i32_1 = arith.constant 0 : i32
    return %c0_i32, %c0_i32_0 : i32, i32
  }
  func.func @transform_3(%arg0: i32) -> (i32, i32) {
    %c0_i32 = arith.constant 0 : i32
    %c0_i32_0 = arith.constant 0 : i32
    %c0_i32_1 = arith.constant 0 : i32
    return %c0_i32, %c0_i32_0 : i32, i32
  }
  func.func @transform_4(%arg0: i32) -> (i32, i32) {
    %c0_i32 = arith.constant 0 : i32
    %c0_i32_0 = arith.constant 0 : i32
    %c0_i32_1 = arith.constant 0 : i32
    return %c0_i32, %c0_i32_0 : i32, i32
  }
  func.func @transform_5(%arg0: i32) -> (i32, i32) {
    %c0_i32 = arith.constant 0 : i32
    %c0_i32_0 = arith.constant 0 : i32
    return %arg0, %c0_i32 : i32, i32
  }
}

</mosaic_0001>

<bundles_post_ra>
// kernel: tpu_custom_call.1
= control target key start
LH: loop header
LB: loop body
LE: loop exit
PB: predicated region body
PF: predicated region fallthrough
CT: control target
= control target key end

     0   :  { %vm29_vm0 = vcmask 1043456   ;;  %v263_v2 = vmov 0.0   ;;  %vm25_vm1 = vcmask 31744   ;;  %s314_s0 = inlined_call_operand.vmem [shape: f32[8,4], index: 0, kind: input, shape index: {}]   ;;  %s315_s1 = inlined_call_operand.vmem [shape: f32[8,4], index: 1, kind: input, shape index: {}]   ;;  %s316_s2 = inlined_call_operand.vmem [shape: f32[4,128], index: 2, kind: input, shape index: {}]   ;;  %s317_s3 = inlined_call_operand.vmem [shape: f32[4,128], index: 3, kind: input, shape index: {}]   ;;  %s318_s4 = inlined_call_operand.vmem [shape: f32[1,128], index: 4, kind: input, shape index: {}]   ;;  %s319_s5 = inlined_call_operand.hbm [shape: f32[8,128], index: 5, kind: output, shape index: {}]  }
   0x1   :  { %v24_v0 = vld [vmem:[%s317_s3] sm:$0xf]  ;;  %228 = vmatprep.subr.mxu0 %v263_v2  ;;  %233 = vmatprep.subr.mxu1 %v263_v2 }
   0x2   :  { %v23_v1 = vld [vmem:[%s315_s1] sm:$0xff] }
   0x3   :  { %v22_v3 = vld [vmem:[%s316_s2] sm:$0xf] }
   0x4   :  { %v21_v4 = vld [vmem:[%s314_s0] sm:$0xff] }
   0x5   :  { %10 = vsyncpa [#allocation3], 0  ;;  %229 = vmatpush3.msk.msra.mxu0 %vm29_vm0, %v24_v0  ;;  %vm264_vm2 = vmmov 0   ;;  %234 = vmatpush3.msk.msra.mxu1 %vm29_vm0, %v22_v3  ;;  %v220_v7 = vld [vmem:[%s318_s4] ss:$0 sm:$0xff]  ;;  %s265_s0 = smov [#allocation2]  }
   0x6   :  { %230 = vmatprep.mubr.msk.f32.mxu0 %vm264_vm2, %v263_v2  ;;  %235 = vmatprep.mubr.msk.f32.mxu1 %vm264_vm2, %v263_v2  ;;  %s208_s2 = sshll.u32 %s265_s0, 4  ;;  %s209_s2 = int_to_ptr.vmem [resolvable:$true] %s208_s2 }
   0x7   :  { %231 = vmatmul.mubr.msk.f32.vlgmr.msra.gmra.mxu0 %vm25_vm1, %v23_v1  ;;  %236 = vmatmul.mubr.msk.f32.vlgmr.msra.gmra.mxu1 %vm25_vm1, %v21_v4  ;;  %s241_s4 = scalar_lea.vmem %s209_s2, 128  ;;  %p246_p1 = scmp.lt.s32.totalorder %s209_s2, %s209_s2 }
   0x8   :  { %p242_p0 = scmp.ne.s32.totalorder %s209_s2, %s241_s4  ;;  %p247_p2 = scmp.lt.s32.totalorder %s241_s4, %s241_s4 }
   0xa   :  { %p248_p3 = por %p247_p2, %p246_p1 }
   0xc   :  { %p249_p4 = pnand %p248_p3, %p242_p0 }
  0xc7   :  { %v99_v5 = vpop.f32.mrf.mxu0  ;;  %v175_v6 = vpop.f32.mrf.mxu1 }
  0xc8   :  { %v176_v8 = vadd.f32 %v175_v6, %v99_v5 }
  0xc9   :  { %v232_v9 = vpop.f32.mrf.mxu0  ;;  %v237_v10 = vpop.f32.mrf.mxu1 }
  0xca   :  { %v186_v11 = vadd.f32 %v220_v7, %v176_v8 }
  0xcc   :  { %v187_v12 = vmul.f32 %v186_v11, %v186_v11 }
  0xce   :  { %v188_v13 = vmul.f32 1.6059044e-10, %v187_v12  ;;  %v198_v23 = vmul.f32 %v187_v12, %v186_v11 }
  0xd0   :  { %v221_v14 = vadd.f32 -2.5052108e-08, %v188_v13 }
  0xd2   :  { %v190_v15 = vmul.f32 %v221_v14, %v187_v12 }
  0xd4   :  { %v191_v16 = vadd.f32 2.7557319e-06, %v190_v15 }
  0xd6   :  { %v192_v17 = vmul.f32 %v191_v16, %v187_v12 }
  0xd8   :  { %v222_v18 = vadd.f32 -0.0001984127, %v192_v17 }
  0xda   :  { %v194_v19 = vmul.f32 %v222_v18, %v187_v12 }
  0xdc   :  { %v195_v20 = vadd.f32 0.008333334, %v194_v19 }
  0xde   :  { %v196_v21 = vmul.f32 %v195_v20, %v187_v12 }
  0xe0   :  { %v223_v22 = vadd.f32 -0.16666667, %v196_v21 }
  0xe2   :  { %v199_v24 = vmul.f32 %v223_v22, %v198_v23 }
  0xe4   :  { %v200_v25 = vadd.f32 %v199_v24, %v186_v11 }
  0xe6   :  { %201 = vst [vmem:[#allocation2] sm:$0xff] %v200_v25 }
  0xe7   :  { %252 = shalt.err (!%p249_p4)
}
  0xe8   :  { %211 = dma.vmem_to_hbm [thread:$0]  %s209_s2, 128, %s319_s5, [#allocation3]  }
  0xe9   :  { %261 = dma.done.wait [#allocation3], 128  }
  0xea   :  { %262 = vsyncadd [#allocation3], 4294967168 }
  0xeb   :  { %215 = vsyncpa [#allocation3], 1 }

</bundles_post_ra>
